<compile_context>
chip_gen: v7x
topology: tpu7x:2x2x1
jax: 0.10.0
libtpu: 0.0.40
codegen_flags: <defaults>
</compile_context>

<pallas_src>
import jax
import jax.numpy as jnp
from jax.experimental import pallas as pl
from jax.experimental.pallas import tpu as pltpu

M, K, N = 256, 224, 256   # rows, in_features, out_features


def linear_relu_kernel(x_ref, w_ref, b_ref, o_ref):
    # x_ref: (M, K) f32, w_ref: (K, N) f32 (pre-transposed),
    # b_ref: (1, N) f32, o_ref: (M, N) f32
    acc = jnp.dot(x_ref[...], w_ref[...],
                  preferred_element_type=jnp.float32)   # MXU, f32 accumulate
    acc = acc + b_ref[...]                              # bias broadcast (VPU)
    o_ref[...] = jnp.maximum(acc, 0.0)                  # ReLU, lane-dense store


def prepare_params(w, b):
    """One-time parameter prep (done at init time, not per call).

    w: (N, K) f32 in PyTorch layout -> (K, N) f32 so the kernel feeds the MXU
    directly (lane-dense last dim = 256). b: (N,) -> (1, N) for broadcast.
    """
    w_t = jnp.transpose(w).astype(jnp.float32)   # (K, N)
    b2d = b.reshape(1, N).astype(jnp.float32)    # (1, N)
    return w_t, b2d


_cost = pl.CostEstimate(
    flops=2 * M * N * K,
    transcendentals=0,
    bytes_accessed=(M * K * 4) + (K * N * 4) + (N * 4) + (M * N * 4),
)

_vmem_spec = pl.BlockSpec(memory_space=pltpu.MemorySpace.VMEM)


@jax.jit
def linear_relu(x, w_t, b2d):
    """x: (M, K) f32, w_t: (K, N) f32, b2d: (1, N) f32 -> (M, N) f32."""
    return pl.pallas_call(
        linear_relu_kernel,
        out_shape=jax.ShapeDtypeStruct((M, N), jnp.float32),
        in_specs=[_vmem_spec, _vmem_spec, _vmem_spec],
        out_specs=_vmem_spec,
        cost_estimate=_cost,
    )(x, w_t, b2d)


if __name__ == "__main__":
    key = jax.random.PRNGKey(0)
    kx, kw, kb = jax.random.split(key, 3)

    # Deterministic example input (matches torch.randn(256, 224) shape).
    x2 = jax.random.normal(kx, (M, K), dtype=jnp.float32)

    # Deterministic parameter init mimicking nn.Linear defaults
    # (uniform in [-1/sqrt(in_features), 1/sqrt(in_features)]).
    bound = 1.0 / (K ** 0.5)
    w = jax.random.uniform(kw, (N, K), dtype=jnp.float32, minval=-bound, maxval=bound)
    b = jax.random.uniform(kb, (N,), dtype=jnp.float32, minval=-bound, maxval=bound)

    # One-time layout prep (init time), then the per-call kernel.
    w_t, b2d = prepare_params(w, b)
    out = linear_relu(x2, w_t, b2d)
    jax.block_until_ready(out)

    # Cross-check against plain JAX f32 reference. Both paths use the TPU's
    # default matmul precision; small tolerance covers reduction-order /
    # precision-pass differences.
    ref = jnp.maximum(x2 @ w.T + b, 0.0)
    assert out.shape == (M, N)
    assert jnp.allclose(out, ref, atol=2e-2, rtol=2e-2), (
        f"max abs diff = {jnp.max(jnp.abs(out - ref))}"
    )

    print("KERNEL_OK")
</pallas_src>

<mosaic_0001>
module attributes {stable_mosaic.version = 11 : i64} {
  func.func @linear_relu_kernel(%arg0: memref<256x224xf32, #tpu.memory_space<vmem>>, %arg1: memref<224x256xf32, #tpu.memory_space<vmem>>, %arg2: memref<1x256xf32, #tpu.memory_space<vmem>>, %arg3: memref<256x256xf32, #tpu.memory_space<vmem>>) attributes {dimension_semantics = [], scalar_prefetch = 0 : i64, scratch_operands = 0 : i64, tpu.core_type = #tpu.core_type<tc>} {
    %c0 = arith.constant 0 : index
    %c0_0 = arith.constant 0 : index
    %0 = vector.load %arg0[%c0, %c0_0] : memref<256x224xf32, #tpu.memory_space<vmem>>, vector<256x224xf32>
    %c0_1 = arith.constant 0 : index
    %c0_2 = arith.constant 0 : index
    %1 = vector.load %arg1[%c0_1, %c0_2] : memref<224x256xf32, #tpu.memory_space<vmem>>, vector<224x256xf32>
    %cst = arith.constant dense<0.000000e+00> : vector<256x256xf32>
    %2 = tpu.matmul %0, %1, %cst {dimension_numbers = #tpu.dot_dimension_numbers<[1], [0], [0], [1], [0, 0, 1, 1], [], []>} : vector<256x224xf32>, vector<224x256xf32>, vector<256x256xf32> -> vector<256x256xf32>
    %c0_3 = arith.constant 0 : index
    %c0_4 = arith.constant 0 : index
    %3 = vector.load %arg2[%c0_3, %c0_4] : memref<1x256xf32, #tpu.memory_space<vmem>>, vector<1x256xf32>
    %4 = vector.broadcast %3 : vector<1x256xf32> to vector<256x256xf32>
    %5 = arith.addf %2, %4 : vector<256x256xf32>
    %cst_5 = arith.constant 0.000000e+00 : f32
    %6 = vector.broadcast %cst_5 : f32 to vector<256x256xf32>
    %7 = arith.maximumf %5, %6 : vector<256x256xf32>
    %c0_6 = arith.constant 0 : index
    %c0_7 = arith.constant 0 : index
    %8 = vector.load %arg3[%c0_6, %c0_7] : memref<256x256xf32, #tpu.memory_space<vmem>>, vector<256x256xf32>
    tpu.vector_store %arg3[%c0_6, %c0_7], %7 {strides = array<i32>} : memref<256x256xf32, #tpu.memory_space<vmem>>, vector<256x256xf32>,
    return
  }
}

</mosaic_0001>

<bundles_post_ra>
// kernel: linear_relu.1
= control target key start
LH: loop header
LB: loop body
LE: loop exit
PB: predicated region body
PF: predicated region fallthrough
CT: control target
= control target key end

     0   :  { %vm147_vm0 = vcmask 785408   ;;  %s1286_s0 = inlined_call_operand.vmem [shape: f32[256,224], index: 0, kind: input, shape index: {}]   ;;  %s1287_s1 = inlined_call_operand.vmem [shape: f32[224,256], index: 1, kind: input, shape index: {}]   ;;  %s1288_s2 = inlined_call_operand.vmem [shape: f32[1,256], index: 2, kind: input, shape index: {}]   ;;  %s1289_s3 = inlined_call_operand.hbm [shape: f32[256,256], index: 3, kind: output, shape index: {}]  }
   0x1   :  { %v80_v0 = vld [vmem:[%s1287_s1 + $0x8] sm:$0xff]  ;;  %v82_v1 = vld [vmem:[%s1287_s1 + $0x18] sm:$0xff]  ;;  %v79_v2 = vld [vmem:[%s1287_s1] sm:$0xff] }
   0x2   :  { %v677_v3 = vpack.c.bf16 %v82_v1, %v80_v0  ;;  %v81_v4 = vld [vmem:[%s1287_s1 + $0x10] sm:$0xff]  ;;  %v84_v5 = vld [vmem:[%s1287_s1 + $0x28] sm:$0xff]  ;;  %v86_v6 = vld [vmem:[%s1287_s1 + $0x38] sm:$0xff] }
   0x3   :  { %v679_v7 = vpack.c.bf16 %v81_v4, %v79_v2  ;;  %v681_v8 = vpack.c.bf16 %v86_v6, %v84_v5  ;;  %v83_v9 = vld [vmem:[%s1287_s1 + $0x20] sm:$0xff]  ;;  %v85_v10 = vld [vmem:[%s1287_s1 + $0x30] sm:$0xff]  ;;  %v88_v11 = vld [vmem:[%s1287_s1 + $0x48] sm:$0xff] }
   0x4   :  { %678 = vmatprep.subr.bf16.mxu0 %v677_v3  ;;  %733 = vmatprep.subr.bf16.mxu1 %v677_v3  ;;  %v90_v12 = vld [vmem:[%s1287_s1 + $0x58] sm:$0xff]  ;;  %v683_v13 = vpack.c.bf16 %v85_v10, %v83_v9  ;;  %v87_v15 = vld [vmem:[%s1287_s1 + $0x40] sm:$0xff]  ;;  %v89_v16 = vld [vmem:[%s1287_s1 + $0x50] sm:$0xff] }
   0x5   :  { %680 = vmatpush1.bf16.msra.mxu0 %v679_v7  ;;  %747 = vmatpush1.bf16.msra.mxu1 %v679_v7  ;;  %v685_v14 = vpack.c.bf16 %v90_v12, %v88_v11  ;;  %v92_v17 = vld [vmem:[%s1287_s1 + $0x68] sm:$0xff]  ;;  %v94_v18 = vld [vmem:[%s1287_s1 + $0x78] sm:$0xff]  ;;  %v687_v19 = vpack.c.bf16 %v89_v16, %v87_v15  ;;  %v91_v21 = vld [vmem:[%s1287_s1 + $0x60] sm:$0xff] }
   0x6   :  { %682 = vmatprep.subr.bf16.mxu0 %v681_v8  ;;  %734 = vmatprep.subr.bf16.mxu1 %v681_v8  ;;  %v689_v20 = vpack.c.bf16 %v94_v18, %v92_v17  ;;  %v93_v22 = vld [vmem:[%s1287_s1 + $0x70] sm:$0xff]  ;;  %v96_v23 = vld [vmem:[%s1287_s1 + $0x88] sm:$0xff]  ;;  %v98_v24 = vld [vmem:[%s1287_s1 + $0x98] sm:$0xff] }
   0x7   :  { %v691_v25 = vpack.c.bf16 %v93_v22, %v91_v21  ;;  %v693_v26 = vpack.c.bf16 %v98_v24, %v96_v23  ;;  %v95_v27 = vld [vmem:[%s1287_s1 + $0x80] sm:$0xff]  ;;  %v97_v28 = vld [vmem:[%s1287_s1 + $0x90] sm:$0xff]  ;;  %v100_v29 = vld [vmem:[%s1287_s1 + $0xa8] sm:$0xff] }
   0x8   :  { %v102_v30 = vld [vmem:[%s1287_s1 + $0xb8] sm:$0xff]  ;;  %v695_v31 = vpack.c.bf16 %v97_v28, %v95_v27  ;;  %v99_v33 = vld [vmem:[%s1287_s1 + $0xa0] sm:$0xff]  ;;  %v101_v34 = vld [vmem:[%s1287_s1 + $0xb0] sm:$0xff] }
   0x9   :  { %684 = vmatpush1.bf16.msra.mxu0 %v683_v13  ;;  %748 = vmatpush1.bf16.msra.mxu1 %v683_v13  ;;  %v697_v32 = vpack.c.bf16 %v102_v30, %v100_v29  ;;  %v104_v35 = vld [vmem:[%s1287_s1 + $0xc8] sm:$0xff]  ;;  %v106_v36 = vld [vmem:[%s1287_s1 + $0xd8] sm:$0xff]  ;;  %v699_v39 = vpack.c.bf16 %v101_v34, %v99_v33  ;;  %v103_v41 = vld [vmem:[%s1287_s1 + $0xc0] sm:$0xff] }
   0xa   :  { %686 = vmatprep.subr.bf16.mxu0 %v685_v14  ;;  %735 = vmatprep.subr.bf16.mxu1 %v685_v14  ;;  %v16_v37 = vld [vmem:[%s1286_s0 + $0x8] sm:$0xff]  ;;  %v701_v40 = vpack.c.bf16 %v106_v36, %v104_v35  ;;  %v105_v42 = vld [vmem:[%s1287_s1 + $0xd0] sm:$0xff]  ;;  %v110_v44 = vld [vmem:[%s1287_s1 + $0xf8] sm:$0xff] }
   0xb   :  { %645 = vmatprep.mubr.msk.f32.mxu0 %vm147_vm0, %v16_v37  ;;  %v48_v38 = vld [vmem:[%s1286_s0 + $0x108] sm:$0xff]  ;;  %v703_v45 = vpack.c.bf16 %v105_v42, %v103_v41  ;;  %v107_v47 = vld [vmem:[%s1287_s1 + $0xe0] sm:$0xff]  ;;  %v109_v48 = vld [vmem:[%s1287_s1 + $0xf0] sm:$0xff] }
   0xc   :  { %v108_v43 = vld [vmem:[%s1287_s1 + $0xe8] sm:$0xff]  ;;  %661 = vmatprep.mubr.msk.f32.mxu1 %vm147_vm0, %v48_v38  ;;  %v114_v50 = vld [vmem:[%s1287_s1 + $0x118] sm:$0xff]  ;;  %v707_v51 = vpack.c.bf16 %v109_v48, %v107_v47  ;;  %v111_v53 = vld [vmem:[%s1287_s1 + $0x100] sm:$0xff] }
   0xd   :  { %688 = vmatpush1.bf16.msra.mxu0 %v687_v19  ;;  %749 = vmatpush1.bf16.msra.mxu1 %v687_v19  ;;  %v705_v46 = vpack.c.bf16 %v110_v44, %v108_v43  ;;  %v112_v49 = vld [vmem:[%s1287_s1 + $0x108] sm:$0xff]  ;;  %v113_v54 = vld [vmem:[%s1287_s1 + $0x110] sm:$0xff]  ;;  %v118_v56 = vld [vmem:[%s1287_s1 + $0x138] sm:$0xff] }
   0xe   :  { %690 = vmatprep.subr.bf16.mxu0 %v689_v20  ;;  %736 = vmatprep.subr.bf16.mxu1 %v689_v20  ;;  %v709_v52 = vpack.c.bf16 %v114_v50, %v112_v49  ;;  %v116_v55 = vld [vmem:[%s1287_s1 + $0x128] sm:$0xff]  ;;  %v711_v57 = vpack.c.bf16 %v113_v54, %v111_v53  ;;  %v115_v59 = vld [vmem:[%s1287_s1 + $0x120] sm:$0xff]  ;;  %v117_v60 = vld [vmem:[%s1287_s1 + $0x130] sm:$0xff] }
   0xf   :  { %v713_v58 = vpack.c.bf16 %v118_v56, %v116_v55  ;;  %v120_v61 = vld [vmem:[%s1287_s1 + $0x148] sm:$0xff]  ;;  %v122_v62 = vld [vmem:[%s1287_s1 + $0x158] sm:$0xff]  ;;  %v715_v63 = vpack.c.bf16 %v117_v60, %v115_v59  ;;  %v119_v1 = vld [vmem:[%s1287_s1 + $0x140] sm:$0xff] }
  0x10   :  { %v717_v0 = vpack.c.bf16 %v122_v62, %v120_v61  ;;  %v121_v2 = vld [vmem:[%s1287_s1 + $0x150] sm:$0xff]  ;;  %v124_v3 = vld [vmem:[%s1287_s1 + $0x168] sm:$0xff]  ;;  %v126_v4 = vld [vmem:[%s1287_s1 + $0x178] sm:$0xff] }
  0x11   :  { %692 = vmatpush1.bf16.msra.mxu0 %v691_v25  ;;  %750 = vmatpush1.bf16.msra.mxu1 %v691_v25  ;;  %v719_v5 = vpack.c.bf16 %v121_v2, %v119_v1 }
  0x12   :  { %694 = vmatprep.subr.bf16.mxu0 %v693_v26  ;;  %737 = vmatprep.subr.bf16.mxu1 %v693_v26 }
  0x15   :  { %696 = vmatpush1.bf16.msra.mxu0 %v695_v31  ;;  %751 = vmatpush1.bf16.msra.mxu1 %v695_v31 }
  0x16   :  { %698 = vmatprep.subr.bf16.mxu0 %v697_v32  ;;  %738 = vmatprep.subr.bf16.mxu1 %v697_v32 }
  0x19   :  { %700 = vmatpush1.bf16.msra.mxu0 %v699_v39  ;;  %752 = vmatpush1.bf16.msra.mxu1 %v699_v39 }
  0x1a   :  { %702 = vmatprep.subr.bf16.mxu0 %v701_v40  ;;  %739 = vmatprep.subr.bf16.mxu1 %v701_v40 }
  0x1d   :  { %704 = vmatpush1.bf16.msra.mxu0 %v703_v45  ;;  %753 = vmatpush1.bf16.msra.mxu1 %v703_v45 }
  0x1e   :  { %706 = vmatprep.subr.bf16.mxu0 %v705_v46  ;;  %740 = vmatprep.subr.bf16.mxu1 %v705_v46 }
  0x21   :  { %708 = vmatpush1.bf16.msra.mxu0 %v707_v51  ;;  %754 = vmatpush1.bf16.msra.mxu1 %v707_v51 }
  0x22   :  { %710 = vmatprep.subr.bf16.mxu0 %v709_v52  ;;  %741 = vmatprep.subr.bf16.mxu1 %v709_v52 }
  0x25   :  { %712 = vmatpush1.bf16.msra.mxu0 %v711_v57  ;;  %755 = vmatpush1.bf16.msra.mxu1 %v711_v57 }
  0x26   :  { %714 = vmatprep.subr.bf16.mxu0 %v713_v58  ;;  %742 = vmatprep.subr.bf16.mxu1 %v713_v58 }
  0x29   :  { %716 = vmatpush1.bf16.msra.mxu0 %v715_v63  ;;  %756 = vmatpush1.bf16.msra.mxu1 %v715_v63 }
  0x2a   :  { %8 = vsyncpa [#allocation3], 0  ;;  %718 = vmatprep.subr.bf16.mxu0 %v717_v0  ;;  %743 = vmatprep.subr.bf16.mxu1 %v717_v0  ;;  %v721_v6 = vpack.c.bf16 %v126_v4, %v124_v3  ;;  %v123_v7 = vld [vmem:[%s1287_s1 + $0x160] sm:$0xff]  ;;  %v125_v8 = vld [vmem:[%s1287_s1 + $0x170] sm:$0xff] }
  0x2b   :  { %v128_v9 = vld [vmem:[%s1287_s1 + $0x188] sm:$0xff]  ;;  %v130_v10 = vld [vmem:[%s1287_s1 + $0x198] sm:$0xff]  ;;  %v723_v11 = vpack.c.bf16 %v125_v8, %v123_v7  ;;  %v127_v13 = vld [vmem:[%s1287_s1 + $0x180] sm:$0xff] }
  0x2c   :  { %v725_v12 = vpack.c.bf16 %v130_v10, %v128_v9  ;;  %v129_v14 = vld [vmem:[%s1287_s1 + $0x190] sm:$0xff]  ;;  %v132_v15 = vld [vmem:[%s1287_s1 + $0x1a8] sm:$0xff]  ;;  %v134_v16 = vld [vmem:[%s1287_s1 + $0x1b8] sm:$0xff] }
  0x2d   :  { %720 = vmatpush1.bf16.msra.mxu0 %v719_v5  ;;  %757 = vmatpush1.bf16.msra.mxu1 %v719_v5  ;;  %v727_v17 = vpack.c.bf16 %v129_v14, %v127_v13  ;;  %v729_v18 = vpack.c.bf16 %v134_v16, %v132_v15  ;;  %v131_v19 = vld [vmem:[%s1287_s1 + $0x1a0] sm:$0xff]  ;;  %v133_v20 = vld [vmem:[%s1287_s1 + $0x1b0] sm:$0xff]  ;;  %v18_v24 = vld [vmem:[%s1286_s0 + $0x18] sm:$0xff] }
  0x2e   :  { %722 = vmatprep.subr.bf16.mxu0 %v721_v6  ;;  %744 = vmatprep.subr.bf16.mxu1 %v721_v6  ;;  %v731_v21 = vpack.c.bf16 %v133_v20, %v131_v19  ;;  %v15_v22 = vld [vmem:[%s1286_s0] sm:$0xff]  ;;  %v50_v25 = vld [vmem:[%s1286_s0 + $0x118] sm:$0xff]  ;;  %v17_v26 = vld [vmem:[%s1286_s0 + $0x10] sm:$0xff]  ;;  %v137_v20 = vlaneseq }
  0x2f   :  { %v47_v23 = vld [vmem:[%s1286_s0 + $0x100] sm:$0xff]  ;;  %v49_v27 = vld [vmem:[%s1286_s0 + $0x110] sm:$0xff]  ;;  %v20_v28 = vld [vmem:[%s1286_s0 + $0x28] sm:$0xff] }
  0x30   :  { %v52_v29 = vld [vmem:[%s1286_s0 + $0x128] sm:$0xff]  ;;  %v19_v30 = vld [vmem:[%s1286_s0 + $0x20] sm:$0xff]  ;;  %v22_v32 = vld [vmem:[%s1286_s0 + $0x38] sm:$0xff] }
  0x31   :  { %724 = vmatpush1.bf16.msra.mxu0 %v723_v11  ;;  %758 = vmatpush1.bf16.msra.mxu1 %v723_v11  ;;  %v51_v31 = vld [vmem:[%s1286_s0 + $0x120] sm:$0xff]  ;;  %v54_v33 = vld [vmem:[%s1286_s0 + $0x138] sm:$0xff]  ;;  %v21_v34 = vld [vmem:[%s1286_s0 + $0x30] sm:$0xff] }
  0x32   :  { %726 = vmatprep.subr.bf16.mxu0 %v725_v12  ;;  %745 = vmatprep.subr.bf16.mxu1 %v725_v12  ;;  %v53_v35 = vld [vmem:[%s1286_s0 + $0x130] sm:$0xff]  ;;  %v24_v36 = vld [vmem:[%s1286_s0 + $0x48] sm:$0xff]  ;;  %v23_v38 = vld [vmem:[%s1286_s0 + $0x40] sm:$0xff] }
  0x33   :  { %v56_v37 = vld [vmem:[%s1286_s0 + $0x148] sm:$0xff]  ;;  %v55_v39 = vld [vmem:[%s1286_s0 + $0x140] sm:$0xff]  ;;  %v26_v40 = vld [vmem:[%s1286_s0 + $0x58] sm:$0xff] }
  0x34   :  { %v58_v41 = vld [vmem:[%s1286_s0 + $0x158] sm:$0xff]  ;;  %v25_v42 = vld [vmem:[%s1286_s0 + $0x50] sm:$0xff]  ;;  %v28_v44 = vld [vmem:[%s1286_s0 + $0x68] sm:$0xff] }
  0x35   :  { %728 = vmatpush1.bf16.msra.mxu0 %v727_v17  ;;  %759 = vmatpush1.bf16.msra.mxu1 %v727_v17  ;;  %v57_v43 = vld [vmem:[%s1286_s0 + $0x150] sm:$0xff]  ;;  %v60_v45 = vld [vmem:[%s1286_s0 + $0x168] sm:$0xff]  ;;  %v27_v46 = vld [vmem:[%s1286_s0 + $0x60] sm:$0xff] }
  0x36   :  { %730 = vmatprep.subr.bf16.mxu0 %v729_v18  ;;  %746 = vmatprep.subr.bf16.mxu1 %v729_v18  ;;  %v59_v47 = vld [vmem:[%s1286_s0 + $0x160] sm:$0xff]  ;;  %v30_v48 = vld [vmem:[%s1286_s0 + $0x78] sm:$0xff]  ;;  %v29_v50 = vld [vmem:[%s1286_s0 + $0x70] sm:$0xff] }
  0x37   :  { %v62_v49 = vld [vmem:[%s1286_s0 + $0x178] sm:$0xff]  ;;  %v61_v51 = vld [vmem:[%s1286_s0 + $0x170] sm:$0xff]  ;;  %v32_v52 = vld [vmem:[%s1286_s0 + $0x88] sm:$0xff] }
  0x38   :  { %v64_v53 = vld [vmem:[%s1286_s0 + $0x188] sm:$0xff]  ;;  %v31_v54 = vld [vmem:[%s1286_s0 + $0x80] sm:$0xff]  ;;  %v34_v56 = vld [vmem:[%s1286_s0 + $0x98] sm:$0xff] }
  0x39   :  { %732 = vmatpush1.bf16.msra.mxu0 %v731_v21  ;;  %760 = vmatpush1.bf16.msra.mxu1 %v731_v21  ;;  %v63_v55 = vld [vmem:[%s1286_s0 + $0x180] sm:$0xff]  ;;  %v66_v57 = vld [vmem:[%s1286_s0 + $0x198] sm:$0xff]  ;;  %v33_v58 = vld [vmem:[%s1286_s0 + $0x90] sm:$0xff]  ;;  %v138_v21 = vshrl.u32 %v137_v20, 7 }
  0x3a   :  { %v65_v59 = vld [vmem:[%s1286_s0 + $0x190] sm:$0xff]  ;;  %v36_v60 = vld [vmem:[%s1286_s0 + $0xa8] sm:$0xff]  ;;  %v35_v62 = vld [vmem:[%s1286_s0 + $0xa0] sm:$0xff] }
  0x3b   :  { %v68_v61 = vld [vmem:[%s1286_s0 + $0x1a8] sm:$0xff]  ;;  %v67_v63 = vld [vmem:[%s1286_s0 + $0x1a0] sm:$0xff]  ;;  %v38_v0 = vld [vmem:[%s1286_s0 + $0xb8] sm:$0xff] }
  0x3c   :  { %309 = vmatmul.mubr.f32.vlgmr.msra.gmra.mrb[0].mxu0 %v15_v22  ;;  %405 = vmatmul.mubr.f32.vlgmr.msra.gmra.mrb[0].mxu1 %v47_v23  ;;  %v70_v1 = vld [vmem:[%s1286_s0 + $0x1b8] sm:$0xff]  ;;  %v37_v2 = vld [vmem:[%s1286_s0 + $0xb0] sm:$0xff]  ;;  %v40_v4 = vld [vmem:[%s1286_s0 + $0xc8] sm:$0xff]  ;;  %v139_v22 = vsub.s32 0, %v138_v21 }
  0x3d   :  { %646 = vmatprep.mubr.msk.f32.mxu0 %vm147_vm0, %v18_v24  ;;  %662 = vmatprep.mubr.msk.f32.mxu1 %vm147_vm0, %v50_v25  ;;  %v69_v3 = vld [vmem:[%s1286_s0 + $0x1b0] sm:$0xff]  ;;  %v72_v5 = vld [vmem:[%s1286_s0 + $0x1c8] sm:$0xff]  ;;  %v39_v6 = vld [vmem:[%s1286_s0 + $0xc0] sm:$0xff]  ;;  %v143_v24 = vsub.s32 1, %v138_v21 }
  0x3e   :  { %v71_v7 = vld [vmem:[%s1286_s0 + $0x1c0] sm:$0xff]  ;;  %v42_v8 = vld [vmem:[%s1286_s0 + $0xd8] sm:$0xff]  ;;  %v41_v10 = vld [vmem:[%s1286_s0 + $0xd0] sm:$0xff] }
  0x3f   :  { %v74_v9 = vld [vmem:[%s1286_s0 + $0x1d8] sm:$0xff]  ;;  %v73_v11 = vld [vmem:[%s1286_s0 + $0x1d0] sm:$0xff]  ;;  %v44_v12 = vld [vmem:[%s1286_s0 + $0xe8] sm:$0xff] }
  0x40   :  { %315 = vmatmul.mubr.f32.gmra.mrb[2].mxu0 %v17_v26  ;;  %411 = vmatmul.mubr.f32.gmra.mrb[2].mxu1 %v49_v27  ;;  %v76_v13 = vld [vmem:[%s1286_s0 + $0x1e8] sm:$0xff]  ;;  %v43_v14 = vld [vmem:[%s1286_s0 + $0xe0] sm:$0xff]  ;;  %v46_v16 = vld [vmem:[%s1286_s0 + $0xf8] sm:$0xff] }
  0x41   :  { %647 = vmatprep.mubr.msk.f32.mxu0 %vm147_vm0, %v20_v28  ;;  %663 = vmatprep.mubr.msk.f32.mxu1 %vm147_vm0, %v52_v29  ;;  %v75_v15 = vld [vmem:[%s1286_s0 + $0x1e0] sm:$0xff]  ;;  %v78_v17 = vld [vmem:[%s1286_s0 + $0x1f8] sm:$0xff]  ;;  %v45_v18 = vld [vmem:[%s1286_s0 + $0xf0] sm:$0xff] }
  0x42   :  { %v77_v19 = vld [vmem:[%s1286_s0 + $0x1f0] sm:$0xff]  ;;  %v135_v23 = vld [vmem:[%s1288_s2] sm:$0x3]  ;;  %s788_s0 = smov [#allocation2]  }
  0x43   :  { %v1206_v25 = vrot.slane %v135_v23, %v139_v22  ;;  %v1208_v26 = vrot.slane %v135_v23, %v143_v24  ;;  %s634_s2 = sshll.u32 %s788_s0, 4  ;;  %s635_s2 = int_to_ptr.vmem [resolvable:$true] %s634_s2 }
  0x44   :  { %321 = vmatmul.mubr.f32.gmra.mrb[4].mxu0 %v19_v30  ;;  %417 = vmatmul.mubr.f32.gmra.mrb[4].mxu1 %v51_v31  ;;  %s764_s6 = scalar_lea.vmem %s635_s2, 8192  ;;  %p769_p1 = scmp.lt.s32.totalorder %s635_s2, %s635_s2 }
  0x45   :  { %648 = vmatprep.mubr.msk.f32.mxu0 %vm147_vm0, %v22_v32  ;;  %664 = vmatprep.mubr.msk.f32.mxu1 %vm147_vm0, %v54_v33  ;;  %p765_p0 = scmp.ne.s32.totalorder %s635_s2, %s764_s6  ;;  %p770_p2 = scmp.lt.s32.totalorder %s764_s6, %s764_s6 }
  0x47   :  { %p771_p3 = por %p770_p2, %p769_p1 }
  0x48   :  { %327 = vmatmul.mubr.f32.gmra.mrb[6].mxu0 %v21_v34  ;;  %423 = vmatmul.mubr.f32.gmra.mrb[6].mxu1 %v53_v35 }
  0x49   :  { %649 = vmatprep.mubr.msk.f32.mxu0 %vm147_vm0, %v24_v36  ;;  %665 = vmatprep.mubr.msk.f32.mxu1 %vm147_vm0, %v56_v37  ;;  %p772_p4 = pnand %p771_p3, %p765_p0 }
  0x4c   :  { %333 = vmatmul.mubr.f32.gmra.mrb[8].mxu0 %v23_v38  ;;  %429 = vmatmul.mubr.f32.gmra.mrb[8].mxu1 %v55_v39 }
  0x4d   :  { %650 = vmatprep.mubr.msk.f32.mxu0 %vm147_vm0, %v26_v40  ;;  %666 = vmatprep.mubr.msk.f32.mxu1 %vm147_vm0, %v58_v41 }
  0x50   :  { %339 = vmatmul.mubr.f32.gmra.mrb[10].mxu0 %v25_v42  ;;  %435 = vmatmul.mubr.f32.gmra.mrb[10].mxu1 %v57_v43 }
  0x51   :  { %651 = vmatprep.mubr.msk.f32.mxu0 %vm147_vm0, %v28_v44  ;;  %667 = vmatprep.mubr.msk.f32.mxu1 %vm147_vm0, %v60_v45 }
  0x54   :  { %345 = vmatmul.mubr.f32.gmra.mrb[12].mxu0 %v27_v46  ;;  %441 = vmatmul.mubr.f32.gmra.mrb[12].mxu1 %v59_v47 }
  0x55   :  { %652 = vmatprep.mubr.msk.f32.mxu0 %vm147_vm0, %v30_v48  ;;  %668 = vmatprep.mubr.msk.f32.mxu1 %vm147_vm0, %v62_v49 }
  0x58   :  { %351 = vmatmul.mubr.f32.gmra.mrb[14].mxu0 %v29_v50  ;;  %447 = vmatmul.mubr.f32.gmra.mrb[14].mxu1 %v61_v51 }
  0x59   :  { %653 = vmatprep.mubr.msk.f32.mxu0 %vm147_vm0, %v32_v52  ;;  %669 = vmatprep.mubr.msk.f32.mxu1 %vm147_vm0, %v64_v53 }
  0x5c   :  { %357 = vmatmul.mubr.f32.gmra.mrb[16].mxu0 %v31_v54  ;;  %453 = vmatmul.mubr.f32.gmra.mrb[16].mxu1 %v63_v55 }
  0x5d   :  { %654 = vmatprep.mubr.msk.f32.mxu0 %vm147_vm0, %v34_v56  ;;  %670 = vmatprep.mubr.msk.f32.mxu1 %vm147_vm0, %v66_v57 }
  0x60   :  { %363 = vmatmul.mubr.f32.gmra.mrb[18].mxu0 %v33_v58  ;;  %459 = vmatmul.mubr.f32.gmra.mrb[18].mxu1 %v65_v59 }
  0x61   :  { %655 = vmatprep.mubr.msk.f32.mxu0 %vm147_vm0, %v36_v60  ;;  %671 = vmatprep.mubr.msk.f32.mxu1 %vm147_vm0, %v68_v61 }
  0x64   :  { %369 = vmatmul.mubr.f32.gmra.mrb[20].mxu0 %v35_v62  ;;  %465 = vmatmul.mubr.f32.gmra.mrb[20].mxu1 %v67_v63 }
  0x65   :  { %656 = vmatprep.mubr.msk.f32.mxu0 %vm147_vm0, %v38_v0  ;;  %672 = vmatprep.mubr.msk.f32.mxu1 %vm147_vm0, %v70_v1 }
  0x68   :  { %375 = vmatmul.mubr.f32.gmra.mrb[22].mxu0 %v37_v2  ;;  %471 = vmatmul.mubr.f32.gmra.mrb[22].mxu1 %v69_v3 }
  0x69   :  { %657 = vmatprep.mubr.msk.f32.mxu0 %vm147_vm0, %v40_v4  ;;  %673 = vmatprep.mubr.msk.f32.mxu1 %vm147_vm0, %v72_v5 }
  0x6c   :  { %381 = vmatmul.mubr.f32.gmra.mrb[24].mxu0 %v39_v6  ;;  %477 = vmatmul.mubr.f32.gmra.mrb[24].mxu1 %v71_v7 }
  0x6d   :  { %658 = vmatprep.mubr.msk.f32.mxu0 %vm147_vm0, %v42_v8  ;;  %674 = vmatprep.mubr.msk.f32.mxu1 %vm147_vm0, %v74_v9 }
  0x70   :  { %387 = vmatmul.mubr.f32.gmra.mrb[26].mxu0 %v41_v10  ;;  %483 = vmatmul.mubr.f32.gmra.mrb[26].mxu1 %v73_v11 }
  0x71   :  { %659 = vmatprep.mubr.msk.f32.mxu0 %vm147_vm0, %v44_v12  ;;  %675 = vmatprep.mubr.msk.f32.mxu1 %vm147_vm0, %v76_v13 }
  0x74   :  { %393 = vmatmul.mubr.f32.gmra.mrb[28].mxu0 %v43_v14  ;;  %489 = vmatmul.mubr.f32.gmra.mrb[28].mxu1 %v75_v15 }
  0x75   :  { %660 = vmatprep.mubr.msk.f32.mxu0 %vm147_vm0, %v46_v16  ;;  %676 = vmatprep.mubr.msk.f32.mxu1 %vm147_vm0, %v78_v17 }
  0x78   :  { %399 = vmatmul.mubr.f32.gmra.mrb[30].mxu0 %v45_v18  ;;  %495 = vmatmul.mubr.f32.gmra.mrb[30].mxu1 %v77_v19 }
 0x10f   :  { %v310_v27 = vpop.f32.mrb[0].mxu0  ;;  %v406_v28 = vpop.f32.mrb[0].mxu1 }
 0x110   :  { %v311_v29 = vadd.f32 %v310_v27, %v1206_v25  ;;  %v407_v30 = vadd.f32 %v406_v28, %v1206_v25  ;;  %v312_v31 = vpop.f32.mrb[1].mxu0  ;;  %v408_v32 = vpop.f32.mrb[1].mxu1 }
 0x111   :  { %v313_v33 = vadd.f32 %v312_v31, %v1208_v26  ;;  %v409_v34 = vadd.f32 %v408_v32, %v1208_v26 }
 0x112   :  { %v501_v35 = vmax.f32 %v311_v29, 0.0  ;;  %v533_v36 = vmax.f32 %v407_v30, 0.0 }
 0x113   :  { %v502_v37 = vmax.f32 %v313_v33, 0.0  ;;  %v534_v38 = vmax.f32 %v409_v34, 0.0  ;;  %v316_v39 = vpop.f32.mrb[2].mxu0  ;;  %v412_v40 = vpop.f32.mrb[2].mxu1 }
 0x114   :  { %565 = vst [vmem:[#allocation2] sm:$0xff] %v501_v35  ;;  %597 = vst [vmem:[#allocation2 + $0x100] sm:$0xff] %v533_v36  ;;  %v317_v41 = vadd.f32 %v316_v39, %v1206_v25  ;;  %v413_v42 = vadd.f32 %v412_v40, %v1206_v25  ;;  %v318_v43 = vpop.f32.mrb[3].mxu0  ;;  %v414_v44 = vpop.f32.mrb[3].mxu1 }
 0x115   :  { %566 = vst [vmem:[#allocation2 + $0x8] sm:$0xff] %v502_v37  ;;  %598 = vst [vmem:[#allocation2 + $0x108] sm:$0xff] %v534_v38  ;;  %v319_v45 = vadd.f32 %v318_v43, %v1208_v26  ;;  %v415_v46 = vadd.f32 %v414_v44, %v1208_v26 }
 0x116   :  { %v503_v47 = vmax.f32 %v317_v41, 0.0  ;;  %v535_v48 = vmax.f32 %v413_v42, 0.0 }
 0x117   :  { %v504_v49 = vmax.f32 %v319_v45, 0.0  ;;  %v536_v50 = vmax.f32 %v415_v46, 0.0  ;;  %v322_v51 = vpop.f32.mrb[4].mxu0  ;;  %v418_v52 = vpop.f32.mrb[4].mxu1 }
 0x118   :  { %567 = vst [vmem:[#allocation2 + $0x10] sm:$0xff] %v503_v47  ;;  %599 = vst [vmem:[#allocation2 + $0x110] sm:$0xff] %v535_v48  ;;  %v323_v53 = vadd.f32 %v322_v51, %v1206_v25  ;;  %v419_v54 = vadd.f32 %v418_v52, %v1206_v25  ;;  %v324_v55 = vpop.f32.mrb[5].mxu0  ;;  %v420_v56 = vpop.f32.mrb[5].mxu1 }
 0x119   :  { %568 = vst [vmem:[#allocation2 + $0x18] sm:$0xff] %v504_v49  ;;  %600 = vst [vmem:[#allocation2 + $0x118] sm:$0xff] %v536_v50  ;;  %v325_v57 = vadd.f32 %v324_v55, %v1208_v26  ;;  %v421_v58 = vadd.f32 %v420_v56, %v1208_v26 }
 0x11a   :  { %v505_v59 = vmax.f32 %v323_v53, 0.0  ;;  %v537_v60 = vmax.f32 %v419_v54, 0.0 }
 0x11b   :  { %v506_v61 = vmax.f32 %v325_v57, 0.0  ;;  %v538_v62 = vmax.f32 %v421_v58, 0.0  ;;  %v328_v63 = vpop.f32.mrb[6].mxu0  ;;  %v424_v0 = vpop.f32.mrb[6].mxu1 }
 0x11c   :  { %569 = vst [vmem:[#allocation2 + $0x20] sm:$0xff] %v505_v59  ;;  %601 = vst [vmem:[#allocation2 + $0x120] sm:$0xff] %v537_v60  ;;  %v329_v1 = vadd.f32 %v328_v63, %v1206_v25  ;;  %v425_v2 = vadd.f32 %v424_v0, %v1206_v25  ;;  %v330_v3 = vpop.f32.mrb[7].mxu0  ;;  %v426_v4 = vpop.f32.mrb[7].mxu1 }
 0x11d   :  { %570 = vst [vmem:[#allocation2 + $0x28] sm:$0xff] %v506_v61  ;;  %602 = vst [vmem:[#allocation2 + $0x128] sm:$0xff] %v538_v62  ;;  %v331_v5 = vadd.f32 %v330_v3, %v1208_v26  ;;  %v427_v6 = vadd.f32 %v426_v4, %v1208_v26 }
 0x11e   :  { %v507_v7 = vmax.f32 %v329_v1, 0.0  ;;  %v539_v8 = vmax.f32 %v425_v2, 0.0 }
 0x11f   :  { %v508_v9 = vmax.f32 %v331_v5, 0.0  ;;  %v540_v10 = vmax.f32 %v427_v6, 0.0  ;;  %v334_v11 = vpop.f32.mrb[8].mxu0  ;;  %v430_v12 = vpop.f32.mrb[8].mxu1 }
 0x120   :  { %571 = vst [vmem:[#allocation2 + $0x30] sm:$0xff] %v507_v7  ;;  %603 = vst [vmem:[#allocation2 + $0x130] sm:$0xff] %v539_v8  ;;  %v335_v13 = vadd.f32 %v334_v11, %v1206_v25  ;;  %v431_v14 = vadd.f32 %v430_v12, %v1206_v25  ;;  %v336_v15 = vpop.f32.mrb[9].mxu0  ;;  %v432_v16 = vpop.f32.mrb[9].mxu1 }
 0x121   :  { %572 = vst [vmem:[#allocation2 + $0x38] sm:$0xff] %v508_v9  ;;  %604 = vst [vmem:[#allocation2 + $0x138] sm:$0xff] %v540_v10  ;;  %v337_v17 = vadd.f32 %v336_v15, %v1208_v26  ;;  %v433_v18 = vadd.f32 %v432_v16, %v1208_v26 }
 0x122   :  { %v509_v19 = vmax.f32 %v335_v13, 0.0  ;;  %v541_v20 = vmax.f32 %v431_v14, 0.0 }
 0x123   :  { %v510_v21 = vmax.f32 %v337_v17, 0.0  ;;  %v542_v22 = vmax.f32 %v433_v18, 0.0  ;;  %v340_v23 = vpop.f32.mrb[10].mxu0  ;;  %v436_v24 = vpop.f32.mrb[10].mxu1 }
 0x124   :  { %573 = vst [vmem:[#allocation2 + $0x40] sm:$0xff] %v509_v19  ;;  %605 = vst [vmem:[#allocation2 + $0x140] sm:$0xff] %v541_v20  ;;  %v341_v27 = vadd.f32 %v340_v23, %v1206_v25  ;;  %v437_v28 = vadd.f32 %v436_v24, %v1206_v25  ;;  %v342_v29 = vpop.f32.mrb[11].mxu0  ;;  %v438_v30 = vpop.f32.mrb[11].mxu1 }
 0x125   :  { %574 = vst [vmem:[#allocation2 + $0x48] sm:$0xff] %v510_v21  ;;  %606 = vst [vmem:[#allocation2 + $0x148] sm:$0xff] %v542_v22  ;;  %v343_v31 = vadd.f32 %v342_v29, %v1208_v26  ;;  %v439_v32 = vadd.f32 %v438_v30, %v1208_v26 }
 0x126   :  { %v511_v33 = vmax.f32 %v341_v27, 0.0  ;;  %v543_v34 = vmax.f32 %v437_v28, 0.0 }
 0x127   :  { %v512_v35 = vmax.f32 %v343_v31, 0.0  ;;  %v544_v36 = vmax.f32 %v439_v32, 0.0  ;;  %v346_v37 = vpop.f32.mrb[12].mxu0  ;;  %v442_v38 = vpop.f32.mrb[12].mxu1 }
 0x128   :  { %575 = vst [vmem:[#allocation2 + $0x50] sm:$0xff] %v511_v33  ;;  %607 = vst [vmem:[#allocation2 + $0x150] sm:$0xff] %v543_v34  ;;  %v347_v39 = vadd.f32 %v346_v37, %v1206_v25  ;;  %v443_v40 = vadd.f32 %v442_v38, %v1206_v25  ;;  %v348_v41 = vpop.f32.mrb[13].mxu0  ;;  %v444_v42 = vpop.f32.mrb[13].mxu1 }
 0x129   :  { %576 = vst [vmem:[#allocation2 + $0x58] sm:$0xff] %v512_v35  ;;  %608 = vst [vmem:[#allocation2 + $0x158] sm:$0xff] %v544_v36  ;;  %v349_v43 = vadd.f32 %v348_v41, %v1208_v26  ;;  %v445_v44 = vadd.f32 %v444_v42, %v1208_v26 }
 0x12a   :  { %v513_v45 = vmax.f32 %v347_v39, 0.0  ;;  %v545_v46 = vmax.f32 %v443_v40, 0.0 }
 0x12b   :  { %v514_v47 = vmax.f32 %v349_v43, 0.0  ;;  %v546_v48 = vmax.f32 %v445_v44, 0.0  ;;  %v352_v49 = vpop.f32.mrb[14].mxu0  ;;  %v448_v50 = vpop.f32.mrb[14].mxu1 }
 0x12c   :  { %577 = vst [vmem:[#allocation2 + $0x60] sm:$0xff] %v513_v45  ;;  %609 = vst [vmem:[#allocation2 + $0x160] sm:$0xff] %v545_v46  ;;  %v353_v51 = vadd.f32 %v352_v49, %v1206_v25  ;;  %v449_v52 = vadd.f32 %v448_v50, %v1206_v25  ;;  %v354_v53 = vpop.f32.mrb[15].mxu0  ;;  %v450_v54 = vpop.f32.mrb[15].mxu1 }
 0x12d   :  { %578 = vst [vmem:[#allocation2 + $0x68] sm:$0xff] %v514_v47  ;;  %610 = vst [vmem:[#allocation2 + $0x168] sm:$0xff] %v546_v48  ;;  %v355_v55 = vadd.f32 %v354_v53, %v1208_v26  ;;  %v451_v56 = vadd.f32 %v450_v54, %v1208_v26 }
 0x12e   :  { %v515_v57 = vmax.f32 %v353_v51, 0.0  ;;  %v547_v58 = vmax.f32 %v449_v52, 0.0 }
 0x12f   :  { %v516_v59 = vmax.f32 %v355_v55, 0.0  ;;  %v548_v60 = vmax.f32 %v451_v56, 0.0  ;;  %v358_v61 = vpop.f32.mrb[16].mxu0  ;;  %v454_v62 = vpop.f32.mrb[16].mxu1 }
 0x130   :  { %579 = vst [vmem:[#allocation2 + $0x70] sm:$0xff] %v515_v57  ;;  %611 = vst [vmem:[#allocation2 + $0x170] sm:$0xff] %v547_v58  ;;  %v359_v63 = vadd.f32 %v358_v61, %v1206_v25  ;;  %v455_v0 = vadd.f32 %v454_v62, %v1206_v25  ;;  %v360_v1 = vpop.f32.mrb[17].mxu0  ;;  %v456_v2 = vpop.f32.mrb[17].mxu1 }
 0x131   :  { %580 = vst [vmem:[#allocation2 + $0x78] sm:$0xff] %v516_v59  ;;  %612 = vst [vmem:[#allocation2 + $0x178] sm:$0xff] %v548_v60  ;;  %v361_v3 = vadd.f32 %v360_v1, %v1208_v26  ;;  %v457_v4 = vadd.f32 %v456_v2, %v1208_v26 }
 0x132   :  { %v517_v5 = vmax.f32 %v359_v63, 0.0  ;;  %v549_v6 = vmax.f32 %v455_v0, 0.0 }
 0x133   :  { %v518_v7 = vmax.f32 %v361_v3, 0.0  ;;  %v550_v8 = vmax.f32 %v457_v4, 0.0  ;;  %v364_v9 = vpop.f32.mrb[18].mxu0  ;;  %v460_v10 = vpop.f32.mrb[18].mxu1 }
 0x134   :  { %581 = vst [vmem:[#allocation2 + $0x80] sm:$0xff] %v517_v5  ;;  %613 = vst [vmem:[#allocation2 + $0x180] sm:$0xff] %v549_v6  ;;  %v365_v11 = vadd.f32 %v364_v9, %v1206_v25  ;;  %v461_v12 = vadd.f32 %v460_v10, %v1206_v25  ;;  %v366_v13 = vpop.f32.mrb[19].mxu0  ;;  %v462_v14 = vpop.f32.mrb[19].mxu1 }
 0x135   :  { %582 = vst [vmem:[#allocation2 + $0x88] sm:$0xff] %v518_v7  ;;  %614 = vst [vmem:[#allocation2 + $0x188] sm:$0xff] %v550_v8  ;;  %v367_v15 = vadd.f32 %v366_v13, %v1208_v26  ;;  %v463_v16 = vadd.f32 %v462_v14, %v1208_v26 }
 0x136   :  { %v519_v17 = vmax.f32 %v365_v11, 0.0  ;;  %v551_v18 = vmax.f32 %v461_v12, 0.0 }
 0x137   :  { %v520_v19 = vmax.f32 %v367_v15, 0.0  ;;  %v552_v20 = vmax.f32 %v463_v16, 0.0  ;;  %v370_v21 = vpop.f32.mrb[20].mxu0  ;;  %v466_v22 = vpop.f32.mrb[20].mxu1 }
 0x138   :  { %583 = vst [vmem:[#allocation2 + $0x90] sm:$0xff] %v519_v17  ;;  %615 = vst [vmem:[#allocation2 + $0x190] sm:$0xff] %v551_v18  ;;  %v371_v23 = vadd.f32 %v370_v21, %v1206_v25  ;;  %v467_v24 = vadd.f32 %v466_v22, %v1206_v25  ;;  %v372_v27 = vpop.f32.mrb[21].mxu0  ;;  %v468_v28 = vpop.f32.mrb[21].mxu1 }
 0x139   :  { %584 = vst [vmem:[#allocation2 + $0x98] sm:$0xff] %v520_v19  ;;  %616 = vst [vmem:[#allocation2 + $0x198] sm:$0xff] %v552_v20  ;;  %v373_v29 = vadd.f32 %v372_v27, %v1208_v26  ;;  %v469_v30 = vadd.f32 %v468_v28, %v1208_v26 }
 0x13a   :  { %v521_v31 = vmax.f32 %v371_v23, 0.0  ;;  %v553_v32 = vmax.f32 %v467_v24, 0.0 }
 0x13b   :  { %v522_v33 = vmax.f32 %v373_v29, 0.0  ;;  %v554_v34 = vmax.f32 %v469_v30, 0.0  ;;  %v376_v35 = vpop.f32.mrb[22].mxu0  ;;  %v472_v36 = vpop.f32.mrb[22].mxu1 }
 0x13c   :  { %585 = vst [vmem:[#allocation2 + $0xa0] sm:$0xff] %v521_v31  ;;  %617 = vst [vmem:[#allocation2 + $0x1a0] sm:$0xff] %v553_v32  ;;  %v377_v37 = vadd.f32 %v376_v35, %v1206_v25  ;;  %v473_v38 = vadd.f32 %v472_v36, %v1206_v25  ;;  %v378_v39 = vpop.f32.mrb[23].mxu0  ;;  %v474_v40 = vpop.f32.mrb[23].mxu1 }
 0x13d   :  { %586 = vst [vmem:[#allocation2 + $0xa8] sm:$0xff] %v522_v33  ;;  %618 = vst [vmem:[#allocation2 + $0x1a8] sm:$0xff] %v554_v34  ;;  %v379_v41 = vadd.f32 %v378_v39, %v1208_v26  ;;  %v475_v42 = vadd.f32 %v474_v40, %v1208_v26 }
 0x13e   :  { %v523_v43 = vmax.f32 %v377_v37, 0.0  ;;  %v555_v44 = vmax.f32 %v473_v38, 0.0 }
 0x13f   :  { %v524_v45 = vmax.f32 %v379_v41, 0.0  ;;  %v556_v46 = vmax.f32 %v475_v42, 0.0  ;;  %v382_v47 = vpop.f32.mrb[24].mxu0  ;;  %v478_v48 = vpop.f32.mrb[24].mxu1 }
 0x140   :  { %587 = vst [vmem:[#allocation2 + $0xb0] sm:$0xff] %v523_v43  ;;  %619 = vst [vmem:[#allocation2 + $0x1b0] sm:$0xff] %v555_v44  ;;  %v383_v49 = vadd.f32 %v382_v47, %v1206_v25  ;;  %v479_v50 = vadd.f32 %v478_v48, %v1206_v25  ;;  %v384_v51 = vpop.f32.mrb[25].mxu0  ;;  %v480_v52 = vpop.f32.mrb[25].mxu1 }
 0x141   :  { %588 = vst [vmem:[#allocation2 + $0xb8] sm:$0xff] %v524_v45  ;;  %620 = vst [vmem:[#allocation2 + $0x1b8] sm:$0xff] %v556_v46  ;;  %v385_v53 = vadd.f32 %v384_v51, %v1208_v26  ;;  %v481_v54 = vadd.f32 %v480_v52, %v1208_v26 }
 0x142   :  { %v525_v55 = vmax.f32 %v383_v49, 0.0  ;;  %v557_v56 = vmax.f32 %v479_v50, 0.0 }
 0x143   :  { %v526_v57 = vmax.f32 %v385_v53, 0.0  ;;  %v558_v58 = vmax.f32 %v481_v54, 0.0  ;;  %v388_v59 = vpop.f32.mrb[26].mxu0  ;;  %v484_v60 = vpop.f32.mrb[26].mxu1 }
 0x144   :  { %589 = vst [vmem:[#allocation2 + $0xc0] sm:$0xff] %v525_v55  ;;  %621 = vst [vmem:[#allocation2 + $0x1c0] sm:$0xff] %v557_v56  ;;  %v389_v61 = vadd.f32 %v388_v59, %v1206_v25  ;;  %v485_v62 = vadd.f32 %v484_v60, %v1206_v25  ;;  %v390_v63 = vpop.f32.mrb[27].mxu0  ;;  %v486_v0 = vpop.f32.mrb[27].mxu1 }
 0x145   :  { %590 = vst [vmem:[#allocation2 + $0xc8] sm:$0xff] %v526_v57  ;;  %622 = vst [vmem:[#allocation2 + $0x1c8] sm:$0xff] %v558_v58  ;;  %v391_v1 = vadd.f32 %v390_v63, %v1208_v26  ;;  %v487_v2 = vadd.f32 %v486_v0, %v1208_v26 }
 0x146   :  { %v527_v3 = vmax.f32 %v389_v61, 0.0  ;;  %v559_v4 = vmax.f32 %v485_v62, 0.0 }
 0x147   :  { %v528_v5 = vmax.f32 %v391_v1, 0.0  ;;  %v560_v6 = vmax.f32 %v487_v2, 0.0  ;;  %v394_v7 = vpop.f32.mrb[28].mxu0  ;;  %v490_v8 = vpop.f32.mrb[28].mxu1 }
 0x148   :  { %591 = vst [vmem:[#allocation2 + $0xd0] sm:$0xff] %v527_v3  ;;  %623 = vst [vmem:[#allocation2 + $0x1d0] sm:$0xff] %v559_v4  ;;  %v395_v9 = vadd.f32 %v394_v7, %v1206_v25  ;;  %v491_v10 = vadd.f32 %v490_v8, %v1206_v25  ;;  %v396_v11 = vpop.f32.mrb[29].mxu0  ;;  %v492_v12 = vpop.f32.mrb[29].mxu1 }
 0x149   :  { %592 = vst [vmem:[#allocation2 + $0xd8] sm:$0xff] %v528_v5  ;;  %624 = vst [vmem:[#allocation2 + $0x1d8] sm:$0xff] %v560_v6  ;;  %v397_v13 = vadd.f32 %v396_v11, %v1208_v26  ;;  %v493_v14 = vadd.f32 %v492_v12, %v1208_v26 }
 0x14a   :  { %v529_v15 = vmax.f32 %v395_v9, 0.0  ;;  %v561_v16 = vmax.f32 %v491_v10, 0.0 }
 0x14b   :  { %v530_v17 = vmax.f32 %v397_v13, 0.0  ;;  %v562_v18 = vmax.f32 %v493_v14, 0.0  ;;  %v400_v19 = vpop.f32.mrb[30].mxu0  ;;  %v496_v20 = vpop.f32.mrb[30].mxu1 }
 0x14c   :  { %593 = vst [vmem:[#allocation2 + $0xe0] sm:$0xff] %v529_v15  ;;  %625 = vst [vmem:[#allocation2 + $0x1e0] sm:$0xff] %v561_v16  ;;  %v401_v21 = vadd.f32 %v400_v19, %v1206_v25  ;;  %v497_v22 = vadd.f32 %v496_v20, %v1206_v25  ;;  %v402_v23 = vpop.f32.mrb[31].mxu0  ;;  %v498_v24 = vpop.f32.mrb[31].mxu1 }
 0x14d   :  { %594 = vst [vmem:[#allocation2 + $0xe8] sm:$0xff] %v530_v17  ;;  %626 = vst [vmem:[#allocation2 + $0x1e8] sm:$0xff] %v562_v18  ;;  %v403_v27 = vadd.f32 %v402_v23, %v1208_v26  ;;  %v499_v28 = vadd.f32 %v498_v24, %v1208_v26 }
 0x14e   :  { %v531_v29 = vmax.f32 %v401_v21, 0.0  ;;  %v563_v30 = vmax.f32 %v497_v22, 0.0 }
 0x14f   :  { %v532_v31 = vmax.f32 %v403_v27, 0.0  ;;  %v564_v32 = vmax.f32 %v499_v28, 0.0 }
 0x150   :  { %595 = vst [vmem:[#allocation2 + $0xf0] sm:$0xff] %v531_v29  ;;  %627 = vst [vmem:[#allocation2 + $0x1f0] sm:$0xff] %v563_v30 }
 0x151   :  { %596 = vst [vmem:[#allocation2 + $0xf8] sm:$0xff] %v532_v31  ;;  %628 = vst [vmem:[#allocation2 + $0x1f8] sm:$0xff] %v564_v32 }
 0x152   :  { %775 = shalt.err (!%p772_p4)
}
 0x153   :  { %s776_s9 = scalar_lea.hbm %s1289_s3, 8192 }
 0x154   :  { %p777_p5 = scmp.ne.s32.totalorder %s1289_s3, %s776_s9  ;;  %p780_p6 = scmp.lt.u32.totalorder %s776_s9, %s1289_s3 }
 0x156   :  { %p782_p7 = pnand %p780_p6, %p777_p5 }
 0x158   :  { %785 = shalt.err (!%p782_p7)
}
 0x159   :  { %s789_s14 = smov 256   ;;  %s790_s15 = smov 16  }
 0x15a   :  { %640 = dma.vmem_to_hbm [thread:$0]  %s635_s2, 8192, %s1289_s3, [#allocation3], %s789_s14, %s789_s14, %s790_s15  }
 0x15b   :  { %786 = dma.done.wait [#allocation3], 8192  }
 0x15c   :  { %787 = vsyncadd [#allocation3], 4294959104 }
 0x15d   :  { %644 = vsyncpa [#allocation3], 1 }

</bundles_post_ra>
